<compile_context>
chip_gen: v6e
topology: v6e:2x2x1
jax: 0.10.0
libtpu: 0.0.40
codegen_flags: <defaults>
</compile_context>

<pallas_src>
import functools
import math

import jax
import jax.numpy as jnp
from jax import lax
from jax.experimental import pallas as pl
from jax.experimental.pallas import tpu as pltpu


def _layernorm(x, gamma, beta, eps=1e-5):
    # x: (N, D), gamma/beta: (1, D). PyTorch LayerNorm: biased var, eps inside sqrt.
    mean = jnp.mean(x, axis=-1, keepdims=True)
    var = jnp.mean((x - mean) ** 2, axis=-1, keepdims=True)
    return (x - mean) * lax.rsqrt(var + eps) * gamma + beta


def _new_gelu(x):
    # HF NewGELUActivation: 0.5*x*(1+tanh(sqrt(2/pi)*(x+0.044715*x^3)))
    c = math.sqrt(2.0 / math.pi)
    return 0.5 * x * (1.0 + jnp.tanh(c * (x + 0.044715 * x * x * x)))


def block_kernel(x_ref,                    # (B*L, D)
                 g1_ref, b1_ref,           # norm_attn gamma/beta  (1, D)
                 wqkv_ref, bqkv_ref,       # (D, 3D), (1, 3D)
                 wo_ref, bo_ref,           # (D, D),  (1, D)
                 g2_ref, b2_ref,           # norm_ffn gamma/beta   (1, D)
                 w1_ref, bb1_ref,          # (D, F),  (1, F)
                 w2_ref, bb2_ref,          # (F, D),  (1, D)
                 o_ref,                    # (B*L, D)
                 *, n_batch, seq_len, n_heads, is_causal):
    x = x_ref[...].astype(jnp.float32)     # (BL, D)
    BL, D = x.shape
    L = seq_len
    E = D // n_heads
    scale = 1.0 / math.sqrt(E)             # torch scales by 1/sqrt(head_dim)

    # ---- attention mask: built ONCE per call (block-diagonal batch packing
    #      + optional causal), applied with jnp.where (no -inf adds). ----
    valid = None
    if is_causal or n_batch > 1:
        row = lax.broadcasted_iota(jnp.int32, (BL, BL), 0)
        col = lax.broadcasted_iota(jnp.int32, (BL, BL), 1)
        if n_batch > 1:
            same = None
            for b in range(n_batch):       # static loop, compares vs constants
                lo, hi = b * L, (b + 1) * L
                blk = (row >= lo) & (row < hi) & (col >= lo) & (col < hi)
                same = blk if same is None else (same | blk)
            valid = same
        if is_causal:
            causal = col <= row            # within a batch block, col<=row <=> causal
            valid = causal if valid is None else (valid & causal)

    # ---------- Self-attention sub-block (pre-LN) ----------
    x_ln = _layernorm(x, g1_ref[...], b1_ref[...])
    qkv = jnp.dot(x_ln, wqkv_ref[...],
                  preferred_element_type=jnp.float32) + bqkv_ref[...]   # (BL, 3D)

    wo = wo_ref[...]
    attn = jnp.zeros((BL, D), jnp.float32)
    # TODO(synk): at E=8 the per-head lane slices use 8/128 lanes; lane-packing
    # multiple heads into one 128-lane tile would raise MXU/VPU lane density.
    for h in range(n_heads):               # n_heads is a static Python int
        q_h = qkv[:, h * E:(h + 1) * E]                      # (BL, E)
        k_h = qkv[:, D + h * E: D + (h + 1) * E]             # (BL, E)
        v_h = qkv[:, 2 * D + h * E: 2 * D + (h + 1) * E]     # (BL, E)

        # q @ k^T without an explicit transpose: contract last axes of both.
        s = lax.dot_general(q_h, k_h, (((1,), (1,)), ((), ())),
                            preferred_element_type=jnp.float32) * scale  # (BL, BL)
        if valid is not None:
            s = jnp.where(valid, s, jnp.float32(-1e30))
        s = s - jnp.max(s, axis=-1, keepdims=True)
        e = jnp.exp(s)
        p = e * pl.reciprocal(jnp.sum(e, axis=-1, keepdims=True), approx=True)

        pv = jnp.dot(p, v_h, preferred_element_type=jnp.float32)         # (BL, E)
        # Fold the output projection: merged @ wo == sum_h pv_h @ wo[hE:(h+1)E, :]
        attn = attn + jnp.dot(pv, wo[h * E:(h + 1) * E, :],
                              preferred_element_type=jnp.float32)        # (BL, D)

    x = x + attn + bo_ref[...]

    # ---------- Feed-forward sub-block (pre-LN) ----------
    x_ln2 = _layernorm(x, g2_ref[...], b2_ref[...])
    hdn = jnp.dot(x_ln2, w1_ref[...],
                  preferred_element_type=jnp.float32) + bb1_ref[...]
    hdn = _new_gelu(hdn)
    ff = jnp.dot(hdn, w2_ref[...],
                 preferred_element_type=jnp.float32) + bb2_ref[...]

    o_ref[...] = (x + ff).astype(o_ref.dtype)


def transformer_block(x, params, *, n_heads, is_causal):
    B, L, D = x.shape
    F = params["w1"].shape[1]
    BL = B * L
    x2 = x.reshape(BL, D)                  # free wrapper-side reshape

    def full(shape):
        nd = len(shape)
        return pl.BlockSpec(shape, lambda i, _nd=nd: (0,) * _nd)

    in_specs = [
        full((BL, D)),                                       # x (flattened)
        full((1, D)), full((1, D)),                          # ln1 gamma, beta
        full((D, 3 * D)), full((1, 3 * D)),                  # qkv proj
        full((D, D)), full((1, D)),                          # out proj
        full((1, D)), full((1, D)),                          # ln2 gamma, beta
        full((D, F)), full((1, F)),                          # ff up
        full((F, D)), full((1, D)),                          # ff down
    ]
    out_spec = full((BL, D))

    kernel = functools.partial(block_kernel, n_batch=B, seq_len=L,
                               n_heads=n_heads, is_causal=is_causal)
    out2 = pl.pallas_call(
        kernel,
        out_shape=jax.ShapeDtypeStruct((BL, D), x.dtype),
        grid=(1,),                          # single step: whole problem in VMEM
        in_specs=in_specs,
        out_specs=out_spec,
        compiler_params=pltpu.CompilerParams(
            dimension_semantics=("arbitrary",)),
    )(x2,
      params["g1"], params["b1"],
      params["wqkv"], params["bqkv"],
      params["wo"], params["bo"],
      params["g2"], params["b2"],
      params["w1"], params["bb1"],
      params["w2"], params["bb2"])
    return out2.reshape(B, L, D)


# ---------------- plain-JAX reference (sanity check) ----------------
def reference_block(x, params, *, n_heads, is_causal):
    def ln(x, g, b):
        m = jnp.mean(x, -1, keepdims=True)
        v = jnp.mean((x - m) ** 2, -1, keepdims=True)
        return (x - m) / jnp.sqrt(v + 1e-5) * g + b

    B, L, D = x.shape
    E = D // n_heads
    xl = ln(x, params["g1"], params["b1"])
    qkv = xl @ params["wqkv"] + params["bqkv"]
    q, k, v = jnp.split(qkv, 3, axis=-1)
    q = q.reshape(B, L, n_heads, E)
    k = k.reshape(B, L, n_heads, E)
    v = v.reshape(B, L, n_heads, E)
    s = jnp.einsum("blhe,bmhe->bhlm", q, k) / jnp.sqrt(E)
    if is_causal:
        mask = jnp.tril(jnp.ones((L, L), bool))
        s = jnp.where(mask[None, None], s, -jnp.inf)
    p = jax.nn.softmax(s, axis=-1)
    a = jnp.einsum("bhlm,bmhe->blhe", p, v).reshape(B, L, D)
    x = x + a @ params["wo"] + params["bo"]
    xl2 = ln(x, params["g2"], params["b2"])
    h = xl2 @ params["w1"] + params["bb1"]
    h = 0.5 * h * (1 + jnp.tanh(math.sqrt(2 / math.pi) * (h + 0.044715 * h ** 3)))
    return x + h @ params["w2"] + params["bb2"]


if __name__ == "__main__":
    # Config: d_model=32, n_heads=4, d_ff=64, causal, dropout=0.0 (identity)
    B, L, D, H, F = 2, 8, 32, 4, 64
    is_causal = True

    key = jax.random.PRNGKey(0)
    ks = jax.random.split(key, 8)
    params = {
        "g1": jnp.ones((1, D), jnp.float32),
        "b1": jnp.zeros((1, D), jnp.float32),
        "wqkv": 0.02 * jax.random.normal(ks[0], (D, 3 * D), jnp.float32),
        "bqkv": 0.02 * jax.random.normal(ks[1], (1, 3 * D), jnp.float32),
        "wo": 0.02 * jax.random.normal(ks[2], (D, D), jnp.float32),
        "bo": 0.02 * jax.random.normal(ks[3], (1, D), jnp.float32),
        "g2": jnp.ones((1, D), jnp.float32),
        "b2": jnp.zeros((1, D), jnp.float32),
        "w1": 0.02 * jax.random.normal(ks[4], (D, F), jnp.float32),
        "bb1": 0.02 * jax.random.normal(ks[5], (1, F), jnp.float32),
        "w2": 0.02 * jax.random.normal(ks[6], (F, D), jnp.float32),
        "bb2": 0.02 * jax.random.normal(ks[7], (1, D), jnp.float32),
    }
    x = jax.random.normal(jax.random.PRNGKey(42), (B, L, D), jnp.float32)

    out = transformer_block(x, params, n_heads=H, is_causal=is_causal)
    out = jax.block_until_ready(out)

    ref = reference_block(x, params, n_heads=H, is_causal=is_causal)
    assert out.shape == (B, L, D)
    # tolerance accounts for EUP approximate reciprocal in the softmax denom
    assert jnp.allclose(out, ref, atol=2e-3, rtol=2e-3), "mismatch vs reference"

    print("KERNEL_OK")
</pallas_src>

<mosaic_0001>
module attributes {stable_mosaic.version = 11 : i64} {
  func.func @block_kernel(%arg0: i32, %arg1: memref<16x32xf32, #tpu.memory_space<vmem>>, %arg2: memref<1x32xf32, #tpu.memory_space<vmem>>, %arg3: memref<1x32xf32, #tpu.memory_space<vmem>>, %arg4: memref<32x96xf32, #tpu.memory_space<vmem>>, %arg5: memref<1x96xf32, #tpu.memory_space<vmem>>, %arg6: memref<32x32xf32, #tpu.memory_space<vmem>>, %arg7: memref<1x32xf32, #tpu.memory_space<vmem>>, %arg8: memref<1x32xf32, #tpu.memory_space<vmem>>, %arg9: memref<1x32xf32, #tpu.memory_space<vmem>>, %arg10: memref<32x64xf32, #tpu.memory_space<vmem>>, %arg11: memref<1x64xf32, #tpu.memory_space<vmem>>, %arg12: memref<64x32xf32, #tpu.memory_space<vmem>>, %arg13: memref<1x32xf32, #tpu.memory_space<vmem>>, %arg14: memref<16x32xf32, #tpu.memory_space<vmem>>) attributes {dimension_semantics = [#tpu.dimension_semantics<arbitrary>], iteration_bounds = array<i64: 1>, scalar_prefetch = 0 : i64, scratch_operands = 0 : i64, tpu.core_type = #tpu.core_type<tc>, window_params = [{pipeline_mode = #tpu.pipeline_mode<synchronous>, transform_indices = @transform_0, window_bounds = array<i64: 16, 32>}, {pipeline_mode = #tpu.pipeline_mode<synchronous>, transform_indices = @transform_1, window_bounds = array<i64: 1, 32>}, {pipeline_mode = #tpu.pipeline_mode<synchronous>, transform_indices = @transform_2, window_bounds = array<i64: 1, 32>}, {pipeline_mode = #tpu.pipeline_mode<synchronous>, transform_indices = @transform_3, window_bounds = array<i64: 32, 96>}, {pipeline_mode = #tpu.pipeline_mode<synchronous>, transform_indices = @transform_4, window_bounds = array<i64: 1, 96>}, {pipeline_mode = #tpu.pipeline_mode<synchronous>, transform_indices = @transform_5, window_bounds = array<i64: 32, 32>}, {pipeline_mode = #tpu.pipeline_mode<synchronous>, transform_indices = @transform_6, window_bounds = array<i64: 1, 32>}, {pipeline_mode = #tpu.pipeline_mode<synchronous>, transform_indices = @transform_7, window_bounds = array<i64: 1, 32>}, {pipeline_mode = #tpu.pipeline_mode<synchronous>, transform_indices = @transform_8, window_bounds = array<i64: 1, 32>}, {pipeline_mode = #tpu.pipeline_mode<synchronous>, transform_indices = @transform_9, window_bounds = array<i64: 32, 64>}, {pipeline_mode = #tpu.pipeline_mode<synchronous>, transform_indices = @transform_10, window_bounds = array<i64: 1, 64>}, {pipeline_mode = #tpu.pipeline_mode<synchronous>, transform_indices = @transform_11, window_bounds = array<i64: 64, 32>}, {pipeline_mode = #tpu.pipeline_mode<synchronous>, transform_indices = @transform_12, window_bounds = array<i64: 1, 32>}, {pipeline_mode = #tpu.pipeline_mode<synchronous>, transform_indices = @transform_13, window_bounds = array<i64: 16, 32>}]} {
    %c0 = arith.constant 0 : index
    %c0_0 = arith.constant 0 : index
    %0 = vector.load %arg1[%c0, %c0_0] : memref<16x32xf32, #tpu.memory_space<vmem>>, vector<16x32xf32>
    %1 = tpu.iota {dimensions = array<i32: 0>} : vector<16x16xi32>
    %2 = tpu.iota {dimensions = array<i32: 1>} : vector<16x16xi32>
    %c0_i32 = arith.constant 0 : i32
    %3 = vector.broadcast %c0_i32 : i32 to vector<16x16xi32>
    %4 = arith.cmpi sge, %1, %3 : vector<16x16xi32>
    %c8_i32 = arith.constant 8 : i32
    %5 = vector.broadcast %c8_i32 : i32 to vector<16x16xi32>
    %6 = arith.cmpi slt, %1, %5 : vector<16x16xi32>
    %7 = arith.andi %4, %6 : vector<16x16xi1>
    %c0_i32_1 = arith.constant 0 : i32
    %8 = vector.broadcast %c0_i32_1 : i32 to vector<16x16xi32>
    %9 = arith.cmpi sge, %2, %8 : vector<16x16xi32>
    %10 = arith.andi %7, %9 : vector<16x16xi1>
    %c8_i32_2 = arith.constant 8 : i32
    %11 = vector.broadcast %c8_i32_2 : i32 to vector<16x16xi32>
    %12 = arith.cmpi slt, %2, %11 : vector<16x16xi32>
    %13 = arith.andi %10, %12 : vector<16x16xi1>
    %c8_i32_3 = arith.constant 8 : i32
    %14 = vector.broadcast %c8_i32_3 : i32 to vector<16x16xi32>
    %15 = arith.cmpi sge, %1, %14 : vector<16x16xi32>
    %c16_i32 = arith.constant 16 : i32
    %16 = vector.broadcast %c16_i32 : i32 to vector<16x16xi32>
    %17 = arith.cmpi slt, %1, %16 : vector<16x16xi32>
    %18 = arith.andi %15, %17 : vector<16x16xi1>
    %c8_i32_4 = arith.constant 8 : i32
    %19 = vector.broadcast %c8_i32_4 : i32 to vector<16x16xi32>
    %20 = arith.cmpi sge, %2, %19 : vector<16x16xi32>
    %21 = arith.andi %18, %20 : vector<16x16xi1>
    %c16_i32_5 = arith.constant 16 : i32
    %22 = vector.broadcast %c16_i32_5 : i32 to vector<16x16xi32>
    %23 = arith.cmpi slt, %2, %22 : vector<16x16xi32>
    %24 = arith.andi %21, %23 : vector<16x16xi1>
    %25 = arith.ori %13, %24 : vector<16x16xi1>
    %26 = arith.cmpi sle, %2, %1 : vector<16x16xi32>
    %27 = arith.andi %25, %26 : vector<16x16xi1>
    %c0_6 = arith.constant 0 : index
    %c0_7 = arith.constant 0 : index
    %28 = vector.load %arg2[%c0_6, %c0_7] : memref<1x32xf32, #tpu.memory_space<vmem>>, vector<1x32xf32>
    %c0_8 = arith.constant 0 : index
    %c0_9 = arith.constant 0 : index
    %29 = vector.load %arg3[%c0_8, %c0_9] : memref<1x32xf32, #tpu.memory_space<vmem>>, vector<1x32xf32>
    %cst = arith.constant dense<0.000000e+00> : vector<16xf32>
    %30 = vector.multi_reduction <add>, %0, %cst [1] : vector<16x32xf32> to vector<16xf32>
    %31 = vector.shape_cast %30 : vector<16xf32> to vector<16x1xf32>
    %cst_10 = arith.constant 3.200000e+01 : f32
    %32 = vector.broadcast %cst_10 : f32 to vector<16x1xf32>
    %33 = arith.divf %31, %32 : vector<16x1xf32>
    %34 = vector.broadcast %33 : vector<16x1xf32> to vector<16x32xf32>
    %35 = arith.subf %0, %34 : vector<16x32xf32>
    %36 = arith.mulf %35, %35 : vector<16x32xf32>
    %cst_11 = arith.constant dense<0.000000e+00> : vector<16xf32>
    %37 = vector.multi_reduction <add>, %36, %cst_11 [1] : vector<16x32xf32> to vector<16xf32>
    %38 = vector.shape_cast %37 : vector<16xf32> to vector<16x1xf32>
    %cst_12 = arith.constant 3.200000e+01 : f32
    %39 = vector.broadcast %cst_12 : f32 to vector<16x1xf32>
    %40 = arith.divf %38, %39 : vector<16x1xf32>
    %41 = vector.broadcast %33 : vector<16x1xf32> to vector<16x32xf32>
    %42 = arith.subf %0, %41 : vector<16x32xf32>
    %cst_13 = arith.constant 9.99999974E-6 : f32
    %43 = vector.broadcast %cst_13 : f32 to vector<16x1xf32>
    %44 = arith.addf %40, %43 : vector<16x1xf32>
    %45 = math.rsqrt %44 : vector<16x1xf32>
    %46 = vector.broadcast %45 : vector<16x1xf32> to vector<16x32xf32>
    %47 = arith.mulf %42, %46 : vector<16x32xf32>
    %48 = vector.broadcast %28 : vector<1x32xf32> to vector<16x32xf32>
    %49 = arith.mulf %47, %48 : vector<16x32xf32>
    %50 = vector.broadcast %29 : vector<1x32xf32> to vector<16x32xf32>
    %51 = arith.addf %49, %50 : vector<16x32xf32>
    %c0_14 = arith.constant 0 : index
    %c0_15 = arith.constant 0 : index
    %52 = vector.load %arg4[%c0_14, %c0_15] : memref<32x96xf32, #tpu.memory_space<vmem>>, vector<32x96xf32>
    %cst_16 = arith.constant dense<0.000000e+00> : vector<16x96xf32>
    %53 = tpu.matmul %51, %52, %cst_16 {dimension_numbers = #tpu.dot_dimension_numbers<[1], [0], [0], [1], [0, 0, 1, 1], [], []>} : vector<16x32xf32>, vector<32x96xf32>, vector<16x96xf32> -> vector<16x96xf32>
    %c0_17 = arith.constant 0 : index
    %c0_18 = arith.constant 0 : index
    %54 = vector.load %arg5[%c0_17, %c0_18] : memref<1x96xf32, #tpu.memory_space<vmem>>, vector<1x96xf32>
    %55 = vector.broadcast %54 : vector<1x96xf32> to vector<16x96xf32>
    %56 = arith.addf %53, %55 : vector<16x96xf32>
    %c0_19 = arith.constant 0 : index
    %c0_20 = arith.constant 0 : index
    %57 = vector.load %arg6[%c0_19, %c0_20] : memref<32x32xf32, #tpu.memory_space<vmem>>, vector<32x32xf32>
    %cst_21 = arith.constant 0.000000e+00 : f32
    %58 = vector.broadcast %cst_21 : f32 to vector<16x32xf32>
    %59 = vector.extract_strided_slice %56 {offsets = [0, 0], sizes = [16, 8], strides = [1, 1]} : vector<16x96xf32> to vector<16x8xf32>
    %60 = vector.extract_strided_slice %56 {offsets = [0, 32], sizes = [16, 8], strides = [1, 1]} : vector<16x96xf32> to vector<16x8xf32>
    %61 = vector.extract_strided_slice %56 {offsets = [0, 64], sizes = [16, 8], strides = [1, 1]} : vector<16x96xf32> to vector<16x8xf32>
    %cst_22 = arith.constant dense<0.000000e+00> : vector<16x16xf32>
    %62 = tpu.matmul %59, %60, %cst_22 {dimension_numbers = #tpu.dot_dimension_numbers<[1], [1], [0], [0], [0, 0, 1, 0], [], []>} : vector<16x8xf32>, vector<16x8xf32>, vector<16x16xf32> -> vector<16x16xf32>
    %cst_23 = arith.constant 0.353553385 : f32
    %63 = vector.broadcast %cst_23 : f32 to vector<16x16xf32>
    %64 = arith.mulf %62, %63 : vector<16x16xf32>
    %cst_24 = arith.constant -1.000000e+30 : f32
    %65 = vector.broadcast %cst_24 : f32 to vector<16x16xf32>
    %66 = arith.select %27, %64, %65 : vector<16x16xi1>, vector<16x16xf32>
    %cst_25 = arith.constant dense<0xFF800000> : vector<16xf32>
    %67 = vector.multi_reduction <maximumf>, %66, %cst_25 [1] : vector<16x16xf32> to vector<16xf32>
    %68 = vector.shape_cast %67 : vector<16xf32> to vector<16x1xf32>
    %69 = vector.broadcast %68 : vector<16x1xf32> to vector<16x16xf32>
    %70 = arith.subf %66, %69 : vector<16x16xf32>
    %71 = math.exp %70 : vector<16x16xf32>
    %cst_26 = arith.constant dense<0.000000e+00> : vector<16xf32>
    %72 = vector.multi_reduction <add>, %71, %cst_26 [1] : vector<16x16xf32> to vector<16xf32>
    %73 = vector.shape_cast %72 : vector<16xf32> to vector<16x1xf32>
    %74 = tpu.reciprocal %73 {approx = true} : vector<16x1xf32> -> vector<16x1xf32>
    %75 = vector.broadcast %74 : vector<16x1xf32> to vector<16x16xf32>
    %76 = arith.mulf %71, %75 : vector<16x16xf32>
    %cst_27 = arith.constant dense<0.000000e+00> : vector<16x8xf32>
    %77 = tpu.matmul %76, %61, %cst_27 {dimension_numbers = #tpu.dot_dimension_numbers<[1], [0], [0], [1], [0, 0, 1, 1], [], []>} : vector<16x16xf32>, vector<16x8xf32>, vector<16x8xf32> -> vector<16x8xf32>
    %78 = vector.extract_strided_slice %57 {offsets = [0, 0], sizes = [8, 32], strides = [1, 1]} : vector<32x32xf32> to vector<8x32xf32>
    %cst_28 = arith.constant dense<0.000000e+00> : vector<16x32xf32>
    %79 = tpu.matmul %77, %78, %cst_28 {dimension_numbers = #tpu.dot_dimension_numbers<[1], [0], [0], [1], [0, 0, 1, 1], [], []>} : vector<16x8xf32>, vector<8x32xf32>, vector<16x32xf32> -> vector<16x32xf32>
    %80 = arith.addf %58, %79 : vector<16x32xf32>
    %81 = vector.extract_strided_slice %56 {offsets = [0, 8], sizes = [16, 8], strides = [1, 1]} : vector<16x96xf32> to vector<16x8xf32>
    %82 = vector.extract_strided_slice %56 {offsets = [0, 40], sizes = [16, 8], strides = [1, 1]} : vector<16x96xf32> to vector<16x8xf32>
    %83 = vector.extract_strided_slice %56 {offsets = [0, 72], sizes = [16, 8], strides = [1, 1]} : vector<16x96xf32> to vector<16x8xf32>
    %cst_29 = arith.constant dense<0.000000e+00> : vector<16x16xf32>
    %84 = tpu.matmul %81, %82, %cst_29 {dimension_numbers = #tpu.dot_dimension_numbers<[1], [1], [0], [0], [0, 0, 1, 0], [], []>} : vector<16x8xf32>, vector<16x8xf32>, vector<16x16xf32> -> vector<16x16xf32>
    %cst_30 = arith.constant 0.353553385 : f32
    %85 = vector.broadcast %cst_30 : f32 to vector<16x16xf32>
    %86 = arith.mulf %84, %85 : vector<16x16xf32>
    %cst_31 = arith.constant -1.000000e+30 : f32
    %87 = vector.broadcast %cst_31 : f32 to vector<16x16xf32>
    %88 = arith.select %27, %86, %87 : vector<16x16xi1>, vector<16x16xf32>
    %cst_32 = arith.constant dense<0xFF800000> : vector<16xf32>
    %89 = vector.multi_reduction <maximumf>, %88, %cst_32 [1] : vector<16x16xf32> to vector<16xf32>
    %90 = vector.shape_cast %89 : vector<16xf32> to vector<16x1xf32>
    %91 = vector.broadcast %90 : vector<16x1xf32> to vector<16x16xf32>
    %92 = arith.subf %88, %91 : vector<16x16xf32>
    %93 = math.exp %92 : vector<16x16xf32>
    %cst_33 = arith.constant dense<0.000000e+00> : vector<16xf32>
    %94 = vector.multi_reduction <add>, %93, %cst_33 [1] : vector<16x16xf32> to vector<16xf32>
    %95 = vector.shape_cast %94 : vector<16xf32> to vector<16x1xf32>
    %96 = tpu.reciprocal %95 {approx = true} : vector<16x1xf32> -> vector<16x1xf32>
    %97 = vector.broadcast %96 : vector<16x1xf32> to vector<16x16xf32>
    %98 = arith.mulf %93, %97 : vector<16x16xf32>
    %cst_34 = arith.constant dense<0.000000e+00> : vector<16x8xf32>
    %99 = tpu.matmul %98, %83, %cst_34 {dimension_numbers = #tpu.dot_dimension_numbers<[1], [0], [0], [1], [0, 0, 1, 1], [], []>} : vector<16x16xf32>, vector<16x8xf32>, vector<16x8xf32> -> vector<16x8xf32>
    %100 = vector.extract_strided_slice %57 {offsets = [8, 0], sizes = [8, 32], strides = [1, 1]} : vector<32x32xf32> to vector<8x32xf32>
    %cst_35 = arith.constant dense<0.000000e+00> : vector<16x32xf32>
    %101 = tpu.matmul %99, %100, %cst_35 {dimension_numbers = #tpu.dot_dimension_numbers<[1], [0], [0], [1], [0, 0, 1, 1], [], []>} : vector<16x8xf32>, vector<8x32xf32>, vector<16x32xf32> -> vector<16x32xf32>
    %102 = arith.addf %80, %101 : vector<16x32xf32>
    %103 = vector.extract_strided_slice %56 {offsets = [0, 16], sizes = [16, 8], strides = [1, 1]} : vector<16x96xf32> to vector<16x8xf32>
    %104 = vector.extract_strided_slice %56 {offsets = [0, 48], sizes = [16, 8], strides = [1, 1]} : vector<16x96xf32> to vector<16x8xf32>
    %105 = vector.extract_strided_slice %56 {offsets = [0, 80], sizes = [16, 8], strides = [1, 1]} : vector<16x96xf32> to vector<16x8xf32>
    %cst_36 = arith.constant dense<0.000000e+00> : vector<16x16xf32>
    %106 = tpu.matmul %103, %104, %cst_36 {dimension_numbers = #tpu.dot_dimension_numbers<[1], [1], [0], [0], [0, 0, 1, 0], [], []>} : vector<16x8xf32>, vector<16x8xf32>, vector<16x16xf32> -> vector<16x16xf32>
    %cst_37 = arith.constant 0.353553385 : f32
    %107 = vector.broadcast %cst_37 : f32 to vector<16x16xf32>
    %108 = arith.mulf %106, %107 : vector<16x16xf32>
    %cst_38 = arith.constant -1.000000e+30 : f32
    %109 = vector.broadcast %cst_38 : f32 to vector<16x16xf32>
    %110 = arith.select %27, %108, %109 : vector<16x16xi1>, vector<16x16xf32>
    %cst_39 = arith.constant dense<0xFF800000> : vector<16xf32>
    %111 = vector.multi_reduction <maximumf>, %110, %cst_39 [1] : vector<16x16xf32> to vector<16xf32>
    %112 = vector.shape_cast %111 : vector<16xf32> to vector<16x1xf32>
    %113 = vector.broadcast %112 : vector<16x1xf32> to vector<16x16xf32>
    %114 = arith.subf %110, %113 : vector<16x16xf32>
    %115 = math.exp %114 : vector<16x16xf32>
    %cst_40 = arith.constant dense<0.000000e+00> : vector<16xf32>
    %116 = vector.multi_reduction <add>, %115, %cst_40 [1] : vector<16x16xf32> to vector<16xf32>
    %117 = vector.shape_cast %116 : vector<16xf32> to vector<16x1xf32>
    %118 = tpu.reciprocal %117 {approx = true} : vector<16x1xf32> -> vector<16x1xf32>
    %119 = vector.broadcast %118 : vector<16x1xf32> to vector<16x16xf32>
    %120 = arith.mulf %115, %119 : vector<16x16xf32>
    %cst_41 = arith.constant dense<0.000000e+00> : vector<16x8xf32>
    %121 = tpu.matmul %120, %105, %cst_41 {dimension_numbers = #tpu.dot_dimension_numbers<[1], [0], [0], [1], [0, 0, 1, 1], [], []>} : vector<16x16xf32>, vector<16x8xf32>, vector<16x8xf32> -> vector<16x8xf32>
    %122 = vector.extract_strided_slice %57 {offsets = [16, 0], sizes = [8, 32], strides = [1, 1]} : vector<32x32xf32> to vector<8x32xf32>
    %cst_42 = arith.constant dense<0.000000e+00> : vector<16x32xf32>
    %123 = tpu.matmul %121, %122, %cst_42 {dimension_numbers = #tpu.dot_dimension_numbers<[1], [0], [0], [1], [0, 0, 1, 1], [], []>} : vector<16x8xf32>, vector<8x32xf32>, vector<16x32xf32> -> vector<16x32xf32>
    %124 = arith.addf %102, %123 : vector<16x32xf32>
    %125 = vector.extract_strided_slice %56 {offsets = [0, 24], sizes = [16, 8], strides = [1, 1]} : vector<16x96xf32> to vector<16x8xf32>
    %126 = vector.extract_strided_slice %56 {offsets = [0, 56], sizes = [16, 8], strides = [1, 1]} : vector<16x96xf32> to vector<16x8xf32>
    %127 = vector.extract_strided_slice %56 {offsets = [0, 88], sizes = [16, 8], strides = [1, 1]} : vector<16x96xf32> to vector<16x8xf32>
    %cst_43 = arith.constant dense<0.000000e+00> : vector<16x16xf32>
    %128 = tpu.matmul %125, %126, %cst_43 {dimension_numbers = #tpu.dot_dimension_numbers<[1], [1], [0], [0], [0, 0, 1, 0], [], []>} : vector<16x8xf32>, vector<16x8xf32>, vector<16x16xf32> -> vector<16x16xf32>
    %cst_44 = arith.constant 0.353553385 : f32
    %129 = vector.broadcast %cst_44 : f32 to vector<16x16xf32>
    %130 = arith.mulf %128, %129 : vector<16x16xf32>
    %cst_45 = arith.constant -1.000000e+30 : f32
    %131 = vector.broadcast %cst_45 : f32 to vector<16x16xf32>
    %132 = arith.select %27, %130, %131 : vector<16x16xi1>, vector<16x16xf32>
    %cst_46 = arith.constant dense<0xFF800000> : vector<16xf32>
    %133 = vector.multi_reduction <maximumf>, %132, %cst_46 [1] : vector<16x16xf32> to vector<16xf32>
    %134 = vector.shape_cast %133 : vector<16xf32> to vector<16x1xf32>
    %135 = vector.broadcast %134 : vector<16x1xf32> to vector<16x16xf32>
    %136 = arith.subf %132, %135 : vector<16x16xf32>
    %137 = math.exp %136 : vector<16x16xf32>
    %cst_47 = arith.constant dense<0.000000e+00> : vector<16xf32>
    %138 = vector.multi_reduction <add>, %137, %cst_47 [1] : vector<16x16xf32> to vector<16xf32>
    %139 = vector.shape_cast %138 : vector<16xf32> to vector<16x1xf32>
    %140 = tpu.reciprocal %139 {approx = true} : vector<16x1xf32> -> vector<16x1xf32>
    %141 = vector.broadcast %140 : vector<16x1xf32> to vector<16x16xf32>
    %142 = arith.mulf %137, %141 : vector<16x16xf32>
    %cst_48 = arith.constant dense<0.000000e+00> : vector<16x8xf32>
    %143 = tpu.matmul %142, %127, %cst_48 {dimension_numbers = #tpu.dot_dimension_numbers<[1], [0], [0], [1], [0, 0, 1, 1], [], []>} : vector<16x16xf32>, vector<16x8xf32>, vector<16x8xf32> -> vector<16x8xf32>
    %144 = vector.extract_strided_slice %57 {offsets = [24, 0], sizes = [8, 32], strides = [1, 1]} : vector<32x32xf32> to vector<8x32xf32>
    %cst_49 = arith.constant dense<0.000000e+00> : vector<16x32xf32>
    %145 = tpu.matmul %143, %144, %cst_49 {dimension_numbers = #tpu.dot_dimension_numbers<[1], [0], [0], [1], [0, 0, 1, 1], [], []>} : vector<16x8xf32>, vector<8x32xf32>, vector<16x32xf32> -> vector<16x32xf32>
    %146 = arith.addf %124, %145 : vector<16x32xf32>
    %147 = arith.addf %0, %146 : vector<16x32xf32>
    %c0_50 = arith.constant 0 : index
    %c0_51 = arith.constant 0 : index
    %148 = vector.load %arg7[%c0_50, %c0_51] : memref<1x32xf32, #tpu.memory_space<vmem>>, vector<1x32xf32>
    %149 = vector.broadcast %148 : vector<1x32xf32> to vector<16x32xf32>
    %150 = arith.addf %147, %149 : vector<16x32xf32>
    %c0_52 = arith.constant 0 : index
    %c0_53 = arith.constant 0 : index
    %151 = vector.load %arg8[%c0_52, %c0_53] : memref<1x32xf32, #tpu.memory_space<vmem>>, vector<1x32xf32>
    %c0_54 = arith.constant 0 : index
    %c0_55 = arith.constant 0 : index
    %152 = vector.load %arg9[%c0_54, %c0_55] : memref<1x32xf32, #tpu.memory_space<vmem>>, vector<1x32xf32>
    %cst_56 = arith.constant dense<0.000000e+00> : vector<16xf32>
    %153 = vector.multi_reduction <add>, %150, %cst_56 [1] : vector<16x32xf32> to vector<16xf32>
    %154 = vector.shape_cast %153 : vector<16xf32> to vector<16x1xf32>
    %cst_57 = arith.constant 3.200000e+01 : f32
    %155 = vector.broadcast %cst_57 : f32 to vector<16x1xf32>
    %156 = arith.divf %154, %155 : vector<16x1xf32>
    %157 = vector.broadcast %156 : vector<16x1xf32> to vector<16x32xf32>
    %158 = arith.subf %150, %157 : vector<16x32xf32>
    %159 = arith.mulf %158, %158 : vector<16x32xf32>
    %cst_58 = arith.constant dense<0.000000e+00> : vector<16xf32>
    %160 = vector.multi_reduction <add>, %159, %cst_58 [1] : vector<16x32xf32> to vector<16xf32>
    %161 = vector.shape_cast %160 : vector<16xf32> to vector<16x1xf32>
    %cst_59 = arith.constant 3.200000e+01 : f32
    %162 = vector.broadcast %cst_59 : f32 to vector<16x1xf32>
    %163 = arith.divf %161, %162 : vector<16x1xf32>
    %164 = vector.broadcast %156 : vector<16x1xf32> to vector<16x32xf32>
    %165 = arith.subf %150, %164 : vector<16x32xf32>
    %cst_60 = arith.constant 9.99999974E-6 : f32
    %166 = vector.broadcast %cst_60 : f32 to vector<16x1xf32>
    %167 = arith.addf %163, %166 : vector<16x1xf32>
    %168 = math.rsqrt %167 : vector<16x1xf32>
    %169 = vector.broadcast %168 : vector<16x1xf32> to vector<16x32xf32>
    %170 = arith.mulf %165, %169 : vector<16x32xf32>
    %171 = vector.broadcast %151 : vector<1x32xf32> to vector<16x32xf32>
    %172 = arith.mulf %170, %171 : vector<16x32xf32>
    %173 = vector.broadcast %152 : vector<1x32xf32> to vector<16x32xf32>
    %174 = arith.addf %172, %173 : vector<16x32xf32>
    %c0_61 = arith.constant 0 : index
    %c0_62 = arith.constant 0 : index
    %175 = vector.load %arg10[%c0_61, %c0_62] : memref<32x64xf32, #tpu.memory_space<vmem>>, vector<32x64xf32>
    %cst_63 = arith.constant dense<0.000000e+00> : vector<16x64xf32>
    %176 = tpu.matmul %174, %175, %cst_63 {dimension_numbers = #tpu.dot_dimension_numbers<[1], [0], [0], [1], [0, 0, 1, 1], [], []>} : vector<16x32xf32>, vector<32x64xf32>, vector<16x64xf32> -> vector<16x64xf32>
    %c0_64 = arith.constant 0 : index
    %c0_65 = arith.constant 0 : index
    %177 = vector.load %arg11[%c0_64, %c0_65] : memref<1x64xf32, #tpu.memory_space<vmem>>, vector<1x64xf32>
    %178 = vector.broadcast %177 : vector<1x64xf32> to vector<16x64xf32>
    %179 = arith.addf %176, %178 : vector<16x64xf32>
    %cst_66 = arith.constant 5.000000e-01 : f32
    %180 = vector.broadcast %cst_66 : f32 to vector<16x64xf32>
    %181 = arith.mulf %180, %179 : vector<16x64xf32>
    %cst_67 = arith.constant 4.471500e-02 : f32
    %182 = vector.broadcast %cst_67 : f32 to vector<16x64xf32>
    %183 = arith.mulf %182, %179 : vector<16x64xf32>
    %184 = arith.mulf %183, %179 : vector<16x64xf32>
    %185 = arith.mulf %184, %179 : vector<16x64xf32>
    %186 = arith.addf %179, %185 : vector<16x64xf32>
    %cst_68 = arith.constant 0.797884583 : f32
    %187 = vector.broadcast %cst_68 : f32 to vector<16x64xf32>
    %188 = arith.mulf %187, %186 : vector<16x64xf32>
    %189 = math.tanh %188 : vector<16x64xf32>
    %cst_69 = arith.constant 1.000000e+00 : f32
    %190 = vector.broadcast %cst_69 : f32 to vector<16x64xf32>
    %191 = arith.addf %190, %189 : vector<16x64xf32>
    %192 = arith.mulf %181, %191 : vector<16x64xf32>
    %c0_70 = arith.constant 0 : index
    %c0_71 = arith.constant 0 : index
    %193 = vector.load %arg12[%c0_70, %c0_71] : memref<64x32xf32, #tpu.memory_space<vmem>>, vector<64x32xf32>
    %cst_72 = arith.constant dense<0.000000e+00> : vector<16x32xf32>
    %194 = tpu.matmul %192, %193, %cst_72 {dimension_numbers = #tpu.dot_dimension_numbers<[1], [0], [0], [1], [0, 0, 1, 1], [], []>} : vector<16x64xf32>, vector<64x32xf32>, vector<16x32xf32> -> vector<16x32xf32>
    %c0_73 = arith.constant 0 : index
    %c0_74 = arith.constant 0 : index
    %195 = vector.load %arg13[%c0_73, %c0_74] : memref<1x32xf32, #tpu.memory_space<vmem>>, vector<1x32xf32>
    %196 = vector.broadcast %195 : vector<1x32xf32> to vector<16x32xf32>
    %197 = arith.addf %194, %196 : vector<16x32xf32>
    %198 = arith.addf %150, %197 : vector<16x32xf32>
    %c0_75 = arith.constant 0 : index
    %c0_76 = arith.constant 0 : index
    %199 = vector.load %arg14[%c0_75, %c0_76] : memref<16x32xf32, #tpu.memory_space<vmem>>, vector<16x32xf32>
    tpu.vector_store %arg14[%c0_75, %c0_76], %198 {strides = array<i32>} : memref<16x32xf32, #tpu.memory_space<vmem>>, vector<16x32xf32>,
    return
  }
  func.func @transform_0(%arg0: i32) -> (i32, i32) {
    %c0_i32 = arith.constant 0 : i32
    %c0_i32_0 = arith.constant 0 : i32
    %c0_i32_1 = arith.constant 0 : i32
    return %c0_i32, %c0_i32_0 : i32, i32
  }
  func.func @transform_1(%arg0: i32) -> (i32, i32) {
    %c0_i32 = arith.constant 0 : i32
    %c0_i32_0 = arith.constant 0 : i32
    %c0_i32_1 = arith.constant 0 : i32
    return %c0_i32, %c0_i32_0 : i32, i32
  }
  func.func @transform_2(%arg0: i32) -> (i32, i32) {
    %c0_i32 = arith.constant 0 : i32
    %c0_i32_0 = arith.constant 0 : i32
    %c0_i32_1 = arith.constant 0 : i32
    return %c0_i32, %c0_i32_0 : i32, i32
  }
  func.func @transform_3(%arg0: i32) -> (i32, i32) {
    %c0_i32 = arith.constant 0 : i32
    %c0_i32_0 = arith.constant 0 : i32
    %c0_i32_1 = arith.constant 0 : i32
    return %c0_i32, %c0_i32_0 : i32, i32
  }
  func.func @transform_4(%arg0: i32) -> (i32, i32) {
    %c0_i32 = arith.constant 0 : i32
    %c0_i32_0 = arith.constant 0 : i32
    %c0_i32_1 = arith.constant 0 : i32
    return %c0_i32, %c0_i32_0 : i32, i32
  }
  func.func @transform_5(%arg0: i32) -> (i32, i32) {
    %c0_i32 = arith.constant 0 : i32
    %c0_i32_0 = arith.constant 0 : i32
    %c0_i32_1 = arith.constant 0 : i32
    return %c0_i32, %c0_i32_0 : i32, i32
  }
  func.func @transform_6(%arg0: i32) -> (i32, i32) {
    %c0_i32 = arith.constant 0 : i32
    %c0_i32_0 = arith.constant 0 : i32
    %c0_i32_1 = arith.constant 0 : i32
    return %c0_i32, %c0_i32_0 : i32, i32
  }
  func.func @transform_7(%arg0: i32) -> (i32, i32) {
    %c0_i32 = arith.constant 0 : i32
    %c0_i32_0 = arith.constant 0 : i32
    %c0_i32_1 = arith.constant 0 : i32
    return %c0_i32, %c0_i32_0 : i32, i32
  }
  func.func @transform_8(%arg0: i32) -> (i32, i32) {
    %c0_i32 = arith.constant 0 : i32
    %c0_i32_0 = arith.constant 0 : i32
    %c0_i32_1 = arith.constant 0 : i32
    return %c0_i32, %c0_i32_0 : i32, i32
  }
  func.func @transform_9(%arg0: i32) -> (i32, i32) {
    %c0_i32 = arith.constant 0 : i32
    %c0_i32_0 = arith.constant 0 : i32
    %c0_i32_1 = arith.constant 0 : i32
    return %c0_i32, %c0_i32_0 : i32, i32
  }
  func.func @transform_10(%arg0: i32) -> (i32, i32) {
    %c0_i32 = arith.constant 0 : i32
    %c0_i32_0 = arith.constant 0 : i32
    %c0_i32_1 = arith.constant 0 : i32
    return %c0_i32, %c0_i32_0 : i32, i32
  }
  func.func @transform_11(%arg0: i32) -> (i32, i32) {
    %c0_i32 = arith.constant 0 : i32
    %c0_i32_0 = arith.constant 0 : i32
    %c0_i32_1 = arith.constant 0 : i32
    return %c0_i32, %c0_i32_0 : i32, i32
  }
  func.func @transform_12(%arg0: i32) -> (i32, i32) {
    %c0_i32 = arith.constant 0 : i32
    %c0_i32_0 = arith.constant 0 : i32
    %c0_i32_1 = arith.constant 0 : i32
    return %c0_i32, %c0_i32_0 : i32, i32
  }
  func.func @transform_13(%arg0: i32) -> (i32, i32) {
    %c0_i32 = arith.constant 0 : i32
    %c0_i32_0 = arith.constant 0 : i32
    %c0_i32_1 = arith.constant 0 : i32
    return %c0_i32, %c0_i32_0 : i32, i32
  }
}

</mosaic_0001>

<bundles_post_ra>
// kernel: tpu_custom_call.1
= control target key start
LH: loop header
LB: loop body
LE: loop exit
PB: predicated region body
PF: predicated region fallthrough
CT: control target
= control target key end

     0   :  { %18 = vsyncpa [#allocation3], 0  ;;  %s2326_s0 = inlined_call_operand.hbm [shape: f32[16,32], index: 0, kind: input, shape index: {}]   ;;  %s2327_s1 = inlined_call_operand.vmem [shape: f32[1,32], index: 1, kind: input, shape index: {}]   ;;  %s2328_s2 = inlined_call_operand.vmem [shape: f32[1,32], index: 2, kind: input, shape index: {}]   ;;  %s2329_s3 = inlined_call_operand.vmem [shape: f32[32,96], index: 3, kind: input, shape index: {}]   ;;  %s2330_s4 = inlined_call_operand.vmem [shape: f32[1,96], index: 4, kind: input, shape index: {}]   ;;  %s2331_s5 = inlined_call_operand.vmem [shape: f32[32,32], index: 5, kind: input, shape index: {}]   ;;  %s2332_s6 = inlined_call_operand.vmem [shape: f32[1,32], index: 6, kind: input, shape index: {}]   ;;  %s2333_s7 = inlined_call_operand.vmem [shape: f32[1,32], index: 7, kind: input, shape index: {}]   ;;  %s2334_s8 = inlined_call_operand.vmem [shape: f32[1,32], index: 8, kind: input, shape index: {}]   ;;  %s2335_s9 = inlined_call_operand.vmem [shape: f32[32,64], index: 9, kind: input, shape index: {}]   ;;  %s2336_s10 = inlined_call_operand.vmem [shape: f32[1,64], index: 10, kind: input, shape index: {}]   ;;  %s2337_s11 = inlined_call_operand.vmem [shape: f32[64,32], index: 11, kind: input, shape index: {}]   ;;  %s2338_s12 = inlined_call_operand.vmem [shape: f32[1,32], index: 12, kind: input, shape index: {}]   ;;  %s2339_s13 = inlined_call_operand.hbm [shape: f32[16,32], index: 13, kind: output, shape index: {}]  }
   0x1   :  { %19 = vsyncpa [#allocation4], 0  ;;  %s1997_s25 = smov [#allocation2]  }
   0x2   :  { %s25_s26 = sshll.u32 %s1997_s25, 4  ;;  %s26_s26 = int_to_ptr.vmem [resolvable:$true] %s25_s26 }
   0x3   :  { %s1961_s27 = scalar_lea.vmem %s26_s26, 256  ;;  %p1966_p1 = scmp.lt.s32.totalorder %s26_s26, %s26_s26 }
   0x4   :  { %p1962_p0 = scmp.ne.s32.totalorder %s26_s26, %s1961_s27  ;;  %p1967_p2 = scmp.lt.s32.totalorder %s1961_s27, %s1961_s27 }
   0x6   :  { %p1968_p3 = por %p1967_p2, %p1966_p1 }
   0x8   :  { %p1969_p4 = pnand %p1968_p3, %p1962_p0 }
   0xa   :  { %1972 = shalt.err (!%p1969_p4)
}
   0xb   :  { %s1998_s28 = smov 128   ;;  %s1999_s29 = smov 8  }
   0xc   :  { %31 = dma.hbm_to_vmem [thread:$0]  %s2326_s0, 256, %s26_s26, [#allocation3], %s1998_s28, %s1998_s28, %s1999_s29  }
   0xd   :  { %1993 = dma.done.wait [#allocation3], 256  }
   0xe   :  { %1994 = vsyncadd [#allocation3], 4294967040  ;;  %vm98_vm0 = vcmask 261120   ;;  %v2088_v0 = vld [vmem:[#allocation2] sm:$0xff]  ;;  %v2090_v1 = vld [vmem:[#allocation2 + $0x8] sm:$0xff]  ;;  %vm244_vm1 = vcmask 64512   ;;  %v61_v45 = vlaneseq }
   0xf   :  { %v99_v2 = vsel %vm98_vm0, %v2088_v0, 0.0  ;;  %v102_v3 = vsel %vm98_vm0, %v2090_v1, 0.0  ;;  %v145_v14 = vld [vmem:[%s2329_s3 + $0x18] sm:$0xff]  ;;  %v144_v15 = vld [vmem:[%s2329_s3 + $0x10] sm:$0xff]  ;;  %v143_v16 = vld [vmem:[%s2329_s3 + $0x8] sm:$0xff]  ;;  %s2002_s27 = smov 88  }
  0x10   :  { %100 = vadd.xlane.f32.xlu0 %v99_v2  ;;  %1777 = vmatprep.subr.mxu0 %v145_v14  ;;  %v142_v17 = vld [vmem:[%s2329_s3] sm:$0xff]  ;;  %v62_v46 = vshrl.u32 %v61_v45, 7  ;;  %v65_v47 = vand.u32 127, %v61_v45  ;;  %vm332_vm9 = vcmask 130048   ;;  %s2004_s30 = smov 56   ;;  %s2005_s14 = smov 80  }
  0x11   :  { %1778 = vmatpush3.msra.mxu0 %v145_v14  ;;  %v1665_v25 = vld [vmem:[%s2327_s1] ss:$0 sm:$0xff]  ;;  %s2000_s1 = smov 96   ;;  %s2006_s0 = smov 112   ;;  %v236_v50 = vld [vmem:[%s2331_s5 + $0x10] sm:$0xff]  ;;  %vm1562_vm11 = vcmask 523264  }
  0x12   :  { %1779 = vmatprep.subr.mxu0 %v144_v15  ;;  %v1666_v27 = vld [vmem:[%s2328_s2] ss:$0 sm:$0xff]  ;;  %s2001_s2 = smov 120   ;;  %v63_v48 = vadd.s32 8, %v62_v46  ;;  %vm84_vm2 = vcmp.ge.s32.totalorder %v65_v47, 8  ;;  %vm87_vm3 = vcmp.lt.s32.totalorder %v65_v47, 16  ;;  %vm92_vm7 = vcmp.le.s32.totalorder %v65_v47, %v62_v46 }
  0x13   :  { %1780 = vmatpush3.msra.mxu0 %v144_v15  ;;  %v1667_v34 = vld [vmem:[%s2330_s4] ss:$0 sm:$0xff]  ;;  %vm89_vm4 = vmand %vm84_vm2, %vm87_vm3  ;;  %vm75_vm6 = vcmp.lt.s32.totalorder %v65_v47, 8  ;;  %s2003_s4 = smov 64   ;;  %s2007_s15 = smov 72  }
  0x14   :  { %103 = vadd.xlane.f32.xlu0 %v102_v3  ;;  %1781 = vmatprep.subr.mxu0 %v143_v16  ;;  %vm93_vm5 = vcmp.le.s32.totalorder %v65_v47, %v63_v48  ;;  %vm2151_vm10 = vmand %vm75_vm6, %vm92_vm7  ;;  %s2008_s16 = smov 104   ;;  %s2009_s21 = smov 48  }
  0x15   :  { %1782 = vmatpush3.msra.mxu0 %v143_v16  ;;  %vm2147_vm8 = vmand %vm89_vm4, %vm93_vm5  ;;  %s2010_s22 = smov 40  }
  0x16   :  { %1783 = vmatprep.subr.mxu0 %v142_v17 }
  0x17   :  { %1784 = vmatpush3.msra.mxu0 %v142_v17 }
  0x99   :  { %v101_v4 = vpop.xlane.xlu0 %100 }
  0x9a   :  { %v106_v5 = vmul.f32 0.03125, %v101_v4 }
  0x9c   :  { %v108_v6 = vsub.f32 %v2088_v0, %v106_v5 }
  0x9d   :  { %v104_v7 = vpop.xlane.xlu0 %103 }
  0x9e   :  { %v107_v8 = vmul.f32 0.03125, %v104_v7  ;;  %v110_v9 = vmul.f32 %v108_v6, %v108_v6 }
  0xa0   :  { %v109_v10 = vsub.f32 %v2090_v1, %v107_v8  ;;  %v112_v11 = vsel %vm98_vm0, %v110_v9, 0.0 }
  0xa1   :  { %113 = vadd.xlane.f32.xlu1 %v112_v11 }
  0xa2   :  { %v111_v12 = vmul.f32 %v109_v10, %v109_v10 }
  0xa4   :  { %v115_v13 = vsel %vm98_vm0, %v111_v12, 0.0 }
  0xa5   :  { %116 = vadd.xlane.f32.xlu1 %v115_v13 }
 0x12a   :  { %v114_v18 = vpop.xlane.xlu1 %113 }
 0x12b   :  { %v118_v19 = vmul.f32 0.03125, %v114_v18 }
 0x12d   :  { %v120_v20 = vadd.f32 1e-05, %v118_v19 }
 0x12e   :  { %v117_v21 = vpop.xlane.xlu1 %116 }
 0x12f   :  { %1909 = vrsqrt.f32 %v120_v20  ;;  %v119_v22 = vmul.f32 0.03125, %v117_v21 }
 0x131   :  { %v121_v23 = vadd.f32 1e-05, %v119_v22 }
 0x133   :  { %1911 = vrsqrt.f32 %v121_v23 }
 0x13c   :  { %v1910_v24 = vpop.eup %1909 }
 0x13d   :  { %v124_v26 = vmul.f32 %v1910_v24, %v108_v6 }
 0x13f   :  { %v132_v28 = vmul.f32 %v1665_v25, %v124_v26 }
 0x140   :  { %v1912_v29 = vpop.eup %1911 }
 0x141   :  { %v125_v30 = vmul.f32 %v1912_v29, %v109_v10  ;;  %v140_v31 = vadd.f32 %v1666_v27, %v132_v28 }
 0x143   :  { %v133_v32 = vmul.f32 %v1665_v25, %v125_v30  ;;  %1785 = vmatprep.mubr.msk.f32.mxu0 %vm98_vm0, %v140_v31 }
 0x145   :  { %v141_v33 = vadd.f32 %v1666_v27, %v133_v32 }
 0x147   :  { %1786 = vmatmul.mubr.msk.f32.vlgmr.msra.gmra.mxu0 %vm98_vm0, %v141_v33 }
 0x207   :  { %v1787_v35 = vpop.f32.mrf.mxu0 }
 0x208   :  { %v2123_v36 = vadd.f32 %v1787_v35, %v1667_v34 }
 0x209   :  { %v225_v37 = vpop.f32.mrf.mxu0 }
 0x20a   :  { %v2125_v38 = vadd.f32 %v1667_v34, %v225_v37  ;;  %242 = vrot.lane.b32.xlu0 %v2123_v36, %s2000_s1 }
 0x20c   :  { %240 = vrot.lane.b32.xlu1 %v2125_v38, %s2000_s1  ;;  %1792 = vmatprep.mubr.msk.f32.mxu1 %vm244_vm1, %v2125_v38 }
 0x20e   :  { %442 = vrot.lane.b32.xlu0 %v2125_v38, %s2001_s2 }
 0x210   :  { %448 = vrot.lane.b32.xlu1 %v2123_v36, %s2002_s27 }
 0x214   :  { %446 = vrot.lane.b32.xlu1 %v2125_v38, %s2002_s27 }
 0x218   :  { %444 = vrot.lane.b32.xlu1 %v2123_v36, %s2001_s2 }
 0x27c   :  { %v243_v39 = vpop.permute.xlu0 %242 }
 0x27d   :  { %1788 = vmatprep.subr.msk.mxu1 %vm244_vm1, %v243_v39 }
 0x27e   :  { %1789 = vmatpush3.xpose.msk.msra.mxu1 %vm244_vm1, %v243_v39  ;;  %v241_v40 = vpop.permute.xlu1 %240 }
 0x27f   :  { %1790 = vmatprep.subr.msk.mxu1 %vm244_vm1, %v241_v40 }
 0x280   :  { %v443_v42 = vpop.permute.xlu0 %442 }
 0x282   :  { %1791 = vmatpush3.xpose.msk.msra.mxu1 %vm244_vm1, %v241_v40  ;;  %v449_v41 = vpop.permute.xlu1 %448 }
 0x283   :  { %1802 = vmatprep.subr.msk.mxu1 %vm244_vm1, %v449_v41 }
 0x285   :  { %1793 = vmatmul.mubr.msk.f32.vlgmr.msra.gmra.mxu1 %vm244_vm1, %v2123_v36 }
 0x286   :  { %v447_v43 = vpop.permute.xlu1 %446  ;;  %1803 = vmatpush3.xpose.msk.msra.mxu1 %vm244_vm1, %v449_v41  ;;  %1806 = vmatprep.mubr.msk.f32.mxu1 %vm244_vm1, %v443_v42 }
 0x287   :  { %1804 = vmatprep.subr.msk.mxu1 %vm244_vm1, %v447_v43 }
 0x28a   :  { %1805 = vmatpush3.xpose.msk.msra.mxu1 %vm244_vm1, %v447_v43  ;;  %v445_v44 = vpop.permute.xlu1 %444  ;;  %v235_v43 = vld [vmem:[%s2331_s5 + $0x8] sm:$0xff] }
 0x28d   :  { %1807 = vmatmul.mubr.msk.f32.vlgmr.msra.gmra.mxu1 %vm244_vm1, %v445_v44  ;;  %v234_v44 = vld [vmem:[%s2331_s5] sm:$0xff] }
 0x345   :  { %v1794_v49 = vpop.f32.mrf.mxu1 }
 0x346   :  { %v329_v51 = vmul.f32 0.35355338, %v1794_v49 }
 0x347   :  { %v319_v52 = vpop.f32.mrf.mxu1 }
 0x348   :  { %v328_v54 = vmul.f32 0.35355338, %v319_v52  ;;  %v331_v55 = vsel %vm2147_vm8, %v329_v51, -1e+30 }
 0x349   :  { %v336_v56 = vsel %vm332_vm9, %v331_v55, -inf }
 0x34a   :  { %337 = vmax.xlane.f32.xlu1 %v336_v56  ;;  %v330_v57 = vsel %vm2151_vm10, %v328_v54, -1e+30 }
 0x34b   :  { %v333_v58 = vsel %vm332_vm9, %v330_v57, -inf }
 0x34c   :  { %334 = vmax.xlane.f32.xlu0 %v333_v58 }
 0x34d   :  { %v1808_v59 = vpop.f32.mrf.mxu1 }
 0x34e   :  { %v534_v61 = vmul.f32 0.35355338, %v1808_v59 }
 0x34f   :  { %v524_v60 = vpop.f32.mrf.mxu1 }
 0x350   :  { %v533_v62 = vmul.f32 0.35355338, %v524_v60  ;;  %v536_v3 = vsel %vm2147_vm8, %v534_v61, -1e+30 }
 0x351   :  { %v540_v4 = vsel %vm332_vm9, %v536_v3, -inf }
 0x352   :  { %v535_v63 = vsel %vm2151_vm10, %v533_v62, -1e+30 }
 0x353   :  { %v537_v2 = vsel %vm332_vm9, %v535_v63, -inf }
 0x354   :  { %538 = vmax.xlane.f32.xlu0 %v537_v2 }
 0x358   :  { %541 = vmax.xlane.f32.xlu0 %v540_v4 }
 0x3d3   :  { %v338_v5 = vpop.xlane.xlu1 %337 }
 0x3d4   :  { %v340_v6 = vsub.f32 %v331_v55, %v338_v5 }
 0x3d5   :  { %v335_v7 = vpop.xlane.xlu0 %334 }
 0x3d6   :  { %v343_v8 = vmul.f32 1.442695, %v340_v6  ;;  %v339_v9 = vsub.f32 %v330_v57, %v335_v7 }
 0x3d8   :  { %1913 = vpow2.f32 %v343_v8  ;;  %v341_v10 = vmul.f32 1.442695, %v339_v9 }
 0x3da   :  { %1915 = vpow2.f32 %v341_v10 }
 0x3dd   :  { %v539_v11 = vpop.xlane.xlu0 %538 }
 0x3de   :  { %v543_v12 = vsub.f32 %v535_v63, %v539_v11 }
 0x3e0   :  { %v545_v13 = vmul.f32 1.442695, %v543_v12 }
 0x3e1   :  { %v542_v14 = vpop.xlane.xlu0 %541 }
 0x3e2   :  { %1917 = vpow2.f32 %v545_v13  ;;  %v544_v15 = vsub.f32 %v536_v3, %v542_v14 }
 0x3e4   :  { %v547_v16 = vmul.f32 1.442695, %v544_v15 }
 0x3e5   :  { %v1914_v17 = vpop.eup %1913 }
 0x3e6   :  { %1919 = vpow2.f32 %v547_v16  ;;  %v348_v18 = vsel %vm332_vm9, %v1914_v17, 0.0 }
 0x3e7   :  { %v1916_v19 = vpop.eup %1915  ;;  %349 = vadd.xlane.f32.xlu1 %v348_v18 }
 0x3e8   :  { %v345_v20 = vsel %vm332_vm9, %v1916_v19, 0.0 }
 0x3e9   :  { %346 = vadd.xlane.f32.xlu0 %v345_v20 }
 0x3ef   :  { %v1918_v21 = vpop.eup %1917 }
 0x3f0   :  { %v549_v22 = vsel %vm332_vm9, %v1918_v21, 0.0 }
 0x3f1   :  { %550 = vadd.xlane.f32.xlu0 %v549_v22 }
 0x3f3   :  { %v1920_v23 = vpop.eup %1919 }
 0x3f4   :  { %v552_v24 = vsel %vm332_vm9, %v1920_v23, 0.0 }
 0x3f5   :  { %553 = vadd.xlane.f32.xlu1 %v552_v24 }
 0x406   :  { %355 = vrot.lane.b32.xlu1 %v2125_v38, %s2003_s4 }
 0x407   :  { %357 = vrot.lane.b32.xlu0 %v2123_v36, %s2003_s4 }
 0x40a   :  { %561 = vrot.lane.b32.xlu1 %v2123_v36, %s2004_s30 }
 0x40b   :  { %814 = vrot.lane.b32.xlu0 %v2123_v36, %s2005_s14 }
 0x40e   :  { %559 = vrot.lane.b32.xlu1 %v2125_v38, %s2004_s30  ;;  %s2011_s30 = smov [#allocation5]  }
 0x40f   :  { %808 = vrot.lane.b32.xlu0 %v2125_v38, %s2006_s0 }
 0x412   :  { %812 = vrot.lane.b32.xlu1 %v2125_v38, %s2005_s14  ;;  %s1653_s14 = sshll.u32 %s2011_s30, 4  ;;  %s1654_s14 = int_to_ptr.vmem [resolvable:$true] %s1653_s14 }
 0x413   :  { %1101 = vrot.lane.b32.xlu0 %v2123_v36, %s2007_s15  ;;  %p1978_p6 = scmp.lt.s32.totalorder %s1654_s14, %s1654_s14 }
 0x416   :  { %810 = vrot.lane.b32.xlu1 %v2123_v36, %s2006_s0  ;;  %s1973_s0 = scalar_lea.vmem %s1654_s14, 256 }
 0x417   :  { %1095 = vrot.lane.b32.xlu0 %v2125_v38, %s2008_s16  ;;  %p1974_p5 = scmp.ne.s32.totalorder %s1654_s14, %s1973_s0  ;;  %p1979_p7 = scmp.lt.s32.totalorder %s1973_s0, %s1973_s0 }
 0x419   :  { %p1980_p8 = por %p1979_p7, %p1978_p6 }
 0x41a   :  { %1099 = vrot.lane.b32.xlu1 %v2125_v38, %s2007_s15 }
 0x41b   :  { %p1981_p9 = pnand %p1980_p8, %p1974_p5 }
 0x41e   :  { %1097 = vrot.lane.b32.xlu1 %v2123_v36, %s2008_s16 }
 0x470   :  { %v350_v25 = vpop.xlane.xlu1 %349 }
 0x471   :  { %1921 = vrcp.f32 %v350_v25 }
 0x472   :  { %v347_v26 = vpop.xlane.xlu0 %346 }
 0x473   :  { %1923 = vrcp.f32 %v347_v26 }
 0x47a   :  { %v551_v27 = vpop.xlane.xlu0 %550 }
 0x47b   :  { %1925 = vrcp.f32 %v551_v27 }
 0x47e   :  { %v554_v28 = vpop.xlane.xlu1 %553  ;;  %v358_v29 = vpop.permute.xlu0 %357 }
 0x47f   :  { %v1922_v30 = vpop.eup %1921  ;;  %1927 = vrcp.f32 %v554_v28  ;;  %1795 = vmatprep.subr.mxu0 %v358_v29 }
 0x480   :  { %v1924_v31 = vpop.eup %1923  ;;  %1796 = vmatpush3.msra.mxu0 %v358_v29  ;;  %v354_v34 = vmul.f32 %v1922_v30, %v1914_v17 }
 0x481   :  { %v353_v32 = vmul.f32 %v1924_v31, %v1916_v19 }
 0x482   :  { %v356_v33 = vpop.permute.xlu1 %355  ;;  %v815_v46 = vpop.permute.xlu0 %814 }
 0x483   :  { %1797 = vmatprep.subr.mxu0 %v356_v33  ;;  %1799 = vmatprep.mubr.msk.f32.mxu0 %vm332_vm9, %v353_v32 }
 0x484   :  { %1798 = vmatpush3.msra.mxu0 %v356_v33 }
 0x485   :  { %1800 = vmatmul.mubr.msk.f32.vlgmr.msra.gmra.mxu0 %vm332_vm9, %v354_v34 }
 0x486   :  { %v562_v35 = vpop.permute.xlu1 %561  ;;  %v809_v51 = vpop.permute.xlu0 %808 }
 0x487   :  { %1809 = vmatprep.subr.mxu0 %v562_v35 }
 0x488   :  { %v1926_v37 = vpop.eup %1925  ;;  %1810 = vmatpush3.msra.mxu0 %v562_v35 }
 0x489   :  { %v557_v39 = vmul.f32 %v1926_v37, %v1918_v21 }
 0x48a   :  { %v560_v40 = vpop.permute.xlu1 %559  ;;  %v1102_v54 = vpop.permute.xlu0 %1101 }
 0x48b   :  { %1811 = vmatprep.subr.mxu0 %v560_v40  ;;  %1813 = vmatprep.mubr.msk.f32.mxu0 %vm332_vm9, %v557_v39 }
 0x48c   :  { %v1928_v41 = vpop.eup %1927  ;;  %1812 = vmatpush3.msra.mxu0 %v560_v40 }
 0x48d   :  { %v558_v42 = vmul.f32 %v1928_v41, %v1920_v23  ;;  %1816 = vmatprep.subr.mxu0 %v235_v43 }
 0x48e   :  { %v813_v52 = vpop.permute.xlu1 %812  ;;  %v1096_v56 = vpop.permute.xlu0 %1095 }
 0x48f   :  { %1814 = vmatmul.mubr.msk.f32.vlgmr.msra.gmra.mxu0 %vm332_vm9, %v558_v42 }
 0x490   :  { %1817 = vmatpush3.msra.mxu0 %v235_v43 }
 0x491   :  { %1821 = vmatprep.subr.mxu0 %v234_v44 }
 0x492   :  { %v811_v55 = vpop.permute.xlu1 %810 }
 0x496   :  { %v1100_v57 = vpop.permute.xlu1 %1099 }
 0x49a   :  { %v1098_v58 = vpop.permute.xlu1 %1097 }
 0x545   :  { %v1801_v45 = vpop.f32.mrf.mxu0 }
 0x547   :  { %v433_v47 = vpop.f32.mrf.mxu0 }
 0x54f   :  { %v1815_v48 = vpop.f32.mrf.mxu0 }
 0x551   :  { %v637_v49 = vpop.f32.mrf.mxu0 }
 0x552   :  { %1818 = vmatprep.mubr.msk.f32.mxu0 %vm244_vm1, %v637_v49 }
 0x553   :  { %1819 = vmatmul.mubr.msk.f32.vlgmr.msra.gmra.mxu0 %vm244_vm1, %v1815_v48 }
 0x554   :  { %1822 = vmatpush3.msra.mxu0 %v234_v44  ;;  %1823 = vmatprep.mubr.msk.f32.mxu0 %vm244_vm1, %v433_v47 }
 0x555   :  { %1826 = vmatprep.subr.msk.mxu0 %vm244_vm1, %v815_v46 }
 0x557   :  { %1824 = vmatmul.mubr.msk.f32.vlgmr.msra.gmra.mxu0 %vm244_vm1, %v1801_v45 }
 0x558   :  { %1827 = vmatpush3.xpose.msk.msra.mxu0 %vm244_vm1, %v815_v46  ;;  %1830 = vmatprep.mubr.msk.f32.mxu0 %vm244_vm1, %v809_v51 }
 0x559   :  { %1828 = vmatprep.subr.msk.mxu0 %vm244_vm1, %v813_v52 }
 0x55c   :  { %1829 = vmatpush3.xpose.msk.msra.mxu0 %vm244_vm1, %v813_v52 }
 0x55d   :  { %1845 = vmatprep.subr.msk.mxu0 %vm244_vm1, %v1102_v54 }
 0x55f   :  { %1831 = vmatmul.mubr.msk.f32.vlgmr.msra.gmra.mxu0 %vm244_vm1, %v811_v55 }
 0x560   :  { %1846 = vmatpush3.xpose.msk.msra.mxu0 %vm244_vm1, %v1102_v54  ;;  %1849 = vmatprep.mubr.msk.f32.mxu0 %vm244_vm1, %v1096_v56 }
 0x561   :  { %1847 = vmatprep.subr.msk.mxu0 %vm244_vm1, %v1100_v57 }
 0x564   :  { %1848 = vmatpush3.xpose.msk.msra.mxu0 %vm244_vm1, %v1100_v57 }
 0x567   :  { %1850 = vmatmul.mubr.msk.f32.vlgmr.msra.gmra.mxu0 %vm244_vm1, %v1098_v58 }
 0x613   :  { %v1820_v59 = vpop.f32.mrf.mxu0 }
 0x615   :  { %v718_v60 = vpop.f32.mrf.mxu0 }
 0x617   :  { %v1825_v61 = vpop.f32.mrf.mxu0 }
 0x618   :  { %v2209_v62 = vadd.f32 %v1825_v61, %v1820_v59 }
 0x619   :  { %v799_v63 = vpop.f32.mrf.mxu0 }
 0x61a   :  { %v2211_v2 = vadd.f32 %v799_v63, %v718_v60 }
 0x61f   :  { %v1832_v3 = vpop.f32.mrf.mxu0 }
 0x620   :  { %v900_v4 = vmul.f32 0.35355338, %v1832_v3 }
 0x621   :  { %v890_v5 = vpop.f32.mrf.mxu0 }
 0x622   :  { %v899_v6 = vmul.f32 0.35355338, %v890_v5  ;;  %v902_v7 = vsel %vm2147_vm8, %v900_v4, -1e+30 }
 0x623   :  { %v906_v8 = vsel %vm332_vm9, %v902_v7, -inf }
 0x624   :  { %907 = vmax.xlane.f32.xlu1 %v906_v8  ;;  %v901_v9 = vsel %vm2151_vm10, %v899_v6, -1e+30 }
 0x625   :  { %v903_v10 = vsel %vm332_vm9, %v901_v9, -inf }
 0x626   :  { %904 = vmax.xlane.f32.xlu0 %v903_v10 }
 0x627   :  { %v1851_v11 = vpop.f32.mrf.mxu0 }
 0x628   :  { %v1187_v29 = vmul.f32 0.35355338, %v1851_v11 }
 0x629   :  { %v1177_v12 = vpop.f32.mrf.mxu0 }
 0x62a   :  { %v1186_v13 = vmul.f32 0.35355338, %v1177_v12  ;;  %v1189_v30 = vsel %vm2147_vm8, %v1187_v29, -1e+30 }
 0x62b   :  { %v1193_v31 = vsel %vm332_vm9, %v1189_v30, -inf }
 0x62c   :  { %v1188_v14 = vsel %vm2151_vm10, %v1186_v13, -1e+30 }
 0x62d   :  { %v1190_v15 = vsel %vm332_vm9, %v1188_v14, -inf }
 0x635   :  { %925 = vrot.lane.b32.xlu1 %v2125_v38, %s2009_s21 }
 0x659   :  { %1191 = vmax.xlane.f32.xlu1 %v1190_v15 }
 0x6ad   :  { %v908_v16 = vpop.xlane.xlu1 %907 }
 0x6ae   :  { %v910_v17 = vsub.f32 %v902_v7, %v908_v16  ;;  %v1702_v7 = vld [vmem:[%s2332_s6] ss:$0 sm:$0xff] }
 0x6af   :  { %v905_v18 = vpop.xlane.xlu0 %904 }
 0x6b0   :  { %v913_v19 = vmul.f32 1.442695, %v910_v17  ;;  %v909_v20 = vsub.f32 %v901_v9, %v905_v18 }
 0x6b1   :  { %v926_v53 = vpop.permute.xlu1 %925 }
 0x6b2   :  { %1929 = vpow2.f32 %v913_v19  ;;  %v911_v21 = vmul.f32 1.442695, %v909_v20 }
 0x6b4   :  { %1931 = vpow2.f32 %v911_v21 }
 0x6bf   :  { %v1930_v22 = vpop.eup %1929 }
 0x6c0   :  { %v918_v23 = vsel %vm332_vm9, %v1930_v22, 0.0 }
 0x6c1   :  { %v1932_v24 = vpop.eup %1931  ;;  %919 = vadd.xlane.f32.xlu0 %v918_v23  ;;  %v1439_v23 = vld [vmem:[%s2335_s9 + $0x10] sm:$0xff] }
 0x6c2   :  { %v915_v25 = vsel %vm332_vm9, %v1932_v24, 0.0 }
 0x6c5   :  { %916 = vadd.xlane.f32.xlu0 %v915_v25  ;;  %v1437_v25 = vld [vmem:[%s2335_s9] sm:$0xff] }
 0x6db   :  { %927 = vrot.lane.b32.xlu0 %v2123_v36, %s2009_s21 }
 0x6e2   :  { %v1192_v26 = vpop.xlane.xlu1 %1191 }
 0x6e3   :  { %v1196_v27 = vsub.f32 %v1188_v14, %v1192_v26 }
 0x6e5   :  { %v1198_v28 = vmul.f32 1.442695, %v1196_v27 }
 0x6e7   :  { %1933 = vpow2.f32 %v1198_v28 }
 0x6f4   :  { %v1934_v32 = vpop.eup %1933 }
 0x6f5   :  { %v1202_v33 = vsel %vm332_vm9, %v1934_v32, 0.0 }
 0x6fa   :  { %1194 = vmax.xlane.f32.xlu0 %v1193_v31 }
 0x6fe   :  { %1203 = vadd.xlane.f32.xlu0 %v1202_v33 }
 0x714   :  { %1214 = vrot.lane.b32.xlu0 %v2123_v36, %s2010_s22 }
 0x74a   :  { %v920_v34 = vpop.xlane.xlu0 %919 }
 0x74b   :  { %1935 = vrcp.f32 %v920_v34 }
 0x74e   :  { %v917_v35 = vpop.xlane.xlu0 %916 }
 0x74f   :  { %1937 = vrcp.f32 %v917_v35 }
 0x752   :  { %v928_v37 = vpop.permute.xlu0 %927 }
 0x753   :  { %1833 = vmatprep.subr.mxu1 %v928_v37 }
 0x754   :  { %1834 = vmatpush3.msra.mxu1 %v928_v37 }
 0x755   :  { %1835 = vmatprep.subr.mxu1 %v926_v53 }
 0x756   :  { %1836 = vmatpush3.msra.mxu1 %v926_v53 }
 0x757   :  { %1840 = vmatprep.subr.mxu1 %v236_v50 }
 0x758   :  { %v1936_v39 = vpop.eup %1935 }
 0x759   :  { %v924_v42 = vmul.f32 %v1936_v39, %v1930_v22  ;;  %v1440_v22 = vld [vmem:[%s2335_s9 + $0x18] sm:$0xff] }
 0x75a   :  { %1864 = vmatprep.subr.mxu0 %v1440_v22 }
 0x75b   :  { %1865 = vmatpush3.msra.mxu0 %v1440_v22 }
 0x75c   :  { %v1938_v40 = vpop.eup %1937  ;;  %1866 = vmatprep.subr.mxu0 %v1439_v23 }
 0x75d   :  { %v923_v41 = vmul.f32 %v1938_v40, %v1932_v24  ;;  %v1438_v24 = vld [vmem:[%s2335_s9 + $0x8] sm:$0xff]  ;;  %1867 = vmatpush3.msra.mxu0 %v1439_v23 }
 0x75e   :  { %1868 = vmatprep.subr.mxu0 %v1438_v24 }
 0x75f   :  { %1837 = vmatprep.mubr.msk.f32.mxu1 %vm332_vm9, %v923_v41  ;;  %1869 = vmatpush3.msra.mxu0 %v1438_v24 }
 0x760   :  { %1838 = vmatmul.mubr.msk.f32.vlgmr.msra.gmra.mxu1 %vm332_vm9, %v924_v42  ;;  %1870 = vmatprep.subr.mxu0 %v1437_v25  ;;  %v1554_v42 = vld [vmem:[%s2337_s11 + $0x38] sm:$0xff] }
 0x761   :  { %1841 = vmatpush3.msra.mxu1 %v236_v50  ;;  %1871 = vmatpush3.msra.mxu0 %v1437_v25  ;;  %v1704_v50 = vld [vmem:[%s2334_s8] ss:$0 sm:$0xff] }
 0x783   :  { %v1195_v36 = vpop.xlane.xlu0 %1194 }
 0x784   :  { %v1197_v43 = vsub.f32 %v1189_v30, %v1195_v36  ;;  %v1553_v36 = vld [vmem:[%s2337_s11 + $0x30] sm:$0xff] }
 0x786   :  { %v1200_v44 = vmul.f32 1.442695, %v1197_v43  ;;  %v1552_v43 = vld [vmem:[%s2337_s11 + $0x28] sm:$0xff] }
 0x787   :  { %v1204_v45 = vpop.xlane.xlu0 %1203 }
 0x788   :  { %1939 = vpow2.f32 %v1200_v44  ;;  %v1551_v44 = vld [vmem:[%s2337_s11 + $0x20] sm:$0xff] }
 0x789   :  { %1941 = vrcp.f32 %v1204_v45  ;;  %v1550_v45 = vld [vmem:[%s2337_s11 + $0x18] sm:$0xff] }
 0x78b   :  { %v1215_v46 = vpop.permute.xlu0 %1214 }
 0x78c   :  { %1852 = vmatprep.subr.mxu1 %v1215_v46 }
 0x795   :  { %v1940_v47 = vpop.eup %1939 }
 0x796   :  { %v1205_v48 = vsel %vm332_vm9, %v1940_v47, 0.0  ;;  %v1942_v49 = vpop.eup %1941 }
 0x797   :  { %1206 = vadd.xlane.f32.xlu1 %v1205_v48  ;;  %v1210_v55 = vmul.f32 %v1942_v49, %v1934_v32  ;;  %v1703_v32 = vld [vmem:[%s2333_s7] ss:$0 sm:$0xff] }
 0x798   :  { %v1547_v48 = vld [vmem:[%s2337_s11] sm:$0xff] }
 0x799   :  { %v1705_v49 = vld [vmem:[%s2336_s10] ss:$0 sm:$0xff] }
 0x7a8   :  { %1212 = vrot.lane.b32.xlu1 %v2125_v38, %s2010_s22  ;;  %v237_v38 = vld [vmem:[%s2331_s5 + $0x18] sm:$0xff] }
 0x820   :  { %v1839_v51 = vpop.f32.mrf.mxu1  ;;  %v1207_v52 = vpop.xlane.xlu1 %1206 }
 0x821   :  { %1943 = vrcp.f32 %v1207_v52 }
 0x822   :  { %v1003_v54 = vpop.f32.mrf.mxu1 }
 0x823   :  { %1842 = vmatprep.mubr.msk.f32.mxu1 %vm244_vm1, %v1003_v54 }
 0x824   :  { %1843 = vmatmul.mubr.msk.f32.vlgmr.msra.gmra.mxu1 %vm244_vm1, %v1839_v51  ;;  %v1213_v56 = vpop.permute.xlu1 %1212 }
 0x825   :  { %1853 = vmatpush3.msra.mxu1 %v1215_v46  ;;  %1856 = vmatprep.mubr.msk.f32.mxu1 %vm332_vm9, %v1210_v55  ;;  %v1549_v46 = vld [vmem:[%s2337_s11 + $0x10] sm:$0xff] }
 0x826   :  { %1854 = vmatprep.subr.mxu1 %v1213_v56 }
 0x827   :  { %1855 = vmatpush3.msra.mxu1 %v1213_v56 }
 0x828   :  { %1859 = vmatprep.subr.mxu1 %v237_v38 }
 0x82e   :  { %v1944_v57 = vpop.eup %1943 }
 0x82f   :  { %v1211_v58 = vmul.f32 %v1944_v57, %v1940_v47  ;;  %v1548_v47 = vld [vmem:[%s2337_s11 + $0x8] sm:$0xff] }
 0x831   :  { %1857 = vmatmul.mubr.msk.f32.vlgmr.msra.gmra.mxu1 %vm332_vm9, %v1211_v58 }
 0x832   :  { %1860 = vmatpush3.msra.mxu1 %v237_v38 }
 0x833   :  { %1875 = vmatprep.subr.mxu1 %v1554_v42 }
 0x8e4   :  { %v1844_v59 = vpop.f32.mrf.mxu1 }
 0x8e5   :  { %v1094_v60 = vadd.f32 %v1844_v59, %v2209_v62 }
 0x8e6   :  { %v1084_v61 = vpop.f32.mrf.mxu1 }
 0x8e7   :  { %v1093_v63 = vadd.f32 %v1084_v61, %v2211_v2 }
 0x8f1   :  { %v1858_v3 = vpop.f32.mrf.mxu1 }
 0x8f3   :  { %v1290_v4 = vpop.f32.mrf.mxu1 }
 0x8f4   :  { %1861 = vmatprep.mubr.msk.f32.mxu1 %vm244_vm1, %v1290_v4 }
 0x8f5   :  { %1862 = vmatmul.mubr.msk.f32.vlgmr.msra.gmra.mxu1 %vm244_vm1, %v1858_v3 }
 0x8f6   :  { %1876 = vmatpush3.msra.mxu1 %v1554_v42 }
 0x8f7   :  { %1877 = vmatprep.subr.mxu1 %v1553_v36 }
 0x8f8   :  { %1878 = vmatpush3.msra.mxu1 %v1553_v36 }
 0x8f9   :  { %1879 = vmatprep.subr.mxu1 %v1552_v43 }
 0x8fa   :  { %1880 = vmatpush3.msra.mxu1 %v1552_v43 }
 0x8fb   :  { %1881 = vmatprep.subr.mxu1 %v1551_v44 }
 0x8fc   :  { %1882 = vmatpush3.msra.mxu1 %v1551_v44 }
 0x8fd   :  { %1883 = vmatprep.subr.mxu1 %v1550_v45 }
 0x8fe   :  { %1884 = vmatpush3.msra.mxu1 %v1550_v45 }
 0x8ff   :  { %1885 = vmatprep.subr.mxu1 %v1549_v46 }
 0x900   :  { %1886 = vmatpush3.msra.mxu1 %v1549_v46 }
 0x901   :  { %1887 = vmatprep.subr.mxu1 %v1548_v47 }
 0x902   :  { %1888 = vmatpush3.msra.mxu1 %v1548_v47 }
 0x903   :  { %1889 = vmatprep.subr.mxu1 %v1547_v48 }
 0x904   :  { %1890 = vmatpush3.msra.mxu1 %v1547_v48 }
 0x9b5   :  { %v1863_v5 = vpop.f32.mrf.mxu1 }
 0x9b6   :  { %v1381_v6 = vadd.f32 %v1863_v5, %v1094_v60 }
 0x9b7   :  { %v1371_v8 = vpop.f32.mrf.mxu1 }
 0x9b8   :  { %v1383_v9 = vadd.f32 %v1381_v6, %v2090_v1  ;;  %v1380_v10 = vadd.f32 %v1371_v8, %v1093_v63 }
 0x9ba   :  { %v2253_v62 = vadd.f32 %v1702_v7, %v1383_v9  ;;  %v1382_v2 = vadd.f32 %v1380_v10, %v2088_v0 }
 0x9bc   :  { %v2256_v11 = vadd.f32 %v1702_v7, %v1382_v2  ;;  %v1398_v12 = vsel %vm98_vm0, %v2253_v62, 0.0 }
 0x9bd   :  { %1399 = vadd.xlane.f32.xlu0 %v1398_v12 }
 0x9be   :  { %v1395_v13 = vsel %vm98_vm0, %v2256_v11, 0.0 }
 0x9bf   :  { %1396 = vadd.xlane.f32.xlu1 %v1395_v13  ;;  %v1708_v13 = vld [vmem:[%s2338_s12] ss:$0 sm:$0xff] }
 0xa46   :  { %v1400_v14 = vpop.xlane.xlu0 %1399 }
 0xa47   :  { %v1402_v15 = vmul.f32 0.03125, %v1400_v14 }
 0xa48   :  { %v1397_v16 = vpop.xlane.xlu1 %1396 }
 0xa49   :  { %v1404_v1 = vsub.f32 %v2253_v62, %v1402_v15  ;;  %v1401_v17 = vmul.f32 0.03125, %v1397_v16 }
 0xa4b   :  { %v1403_v18 = vsub.f32 %v2256_v11, %v1401_v17  ;;  %v1406_v19 = vmul.f32 %v1404_v1, %v1404_v1 }
 0xa4d   :  { %v1410_v0 = vsel %vm98_vm0, %v1406_v19, 0.0  ;;  %v1405_v20 = vmul.f32 %v1403_v18, %v1403_v18 }
 0xa4e   :  { %1411 = vadd.xlane.f32.xlu1 %v1410_v0 }
 0xa4f   :  { %v1407_v21 = vsel %vm98_vm0, %v1405_v20, 0.0 }
 0xa50   :  { %1408 = vadd.xlane.f32.xlu0 %v1407_v21 }
 0xad7   :  { %v1412_v53 = vpop.xlane.xlu1 %1411 }
 0xad8   :  { %v1414_v26 = vmul.f32 0.03125, %v1412_v53 }
 0xad9   :  { %v1409_v27 = vpop.xlane.xlu0 %1408 }
 0xada   :  { %v1416_v28 = vadd.f32 1e-05, %v1414_v26  ;;  %v1413_v29 = vmul.f32 0.03125, %v1409_v27 }
 0xadc   :  { %1945 = vrsqrt.f32 %v1416_v28  ;;  %v1415_v30 = vadd.f32 1e-05, %v1413_v29 }
 0xade   :  { %1947 = vrsqrt.f32 %v1415_v30 }
 0xae9   :  { %v1946_v31 = vpop.eup %1945 }
 0xaea   :  { %v1420_v33 = vmul.f32 %v1946_v31, %v1404_v1 }
 0xaeb   :  { %v1948_v34 = vpop.eup %1947 }
 0xaec   :  { %v1419_v35 = vmul.f32 %v1948_v34, %v1403_v18  ;;  %v1428_v37 = vmul.f32 %v1703_v32, %v1420_v33 }
 0xaee   :  { %v1427_v39 = vmul.f32 %v1703_v32, %v1419_v35  ;;  %v1436_v41 = vadd.f32 %v1704_v50, %v1428_v37 }
 0xaf0   :  { %v1435_v40 = vadd.f32 %v1704_v50, %v1427_v39 }
 0xaf2   :  { %1872 = vmatprep.mubr.msk.f32.mxu0 %vm98_vm0, %v1435_v40 }
 0xaf3   :  { %1873 = vmatmul.mubr.msk.f32.vlgmr.msra.gmra.mxu0 %vm98_vm0, %v1436_v41 }
 0xbb3   :  { %v1874_v51 = vpop.f32.mrf.mxu0 }
 0xbb4   :  { %v1526_v52 = vadd.f32 %v1874_v51, %v1705_v49 }
 0xbb5   :  { %v1520_v54 = vpop.f32.mrf.mxu0 }
 0xbb6   :  { %v1532_v55 = vmul.f32 0.044715, %v1526_v52  ;;  %v1521_v56 = vadd.f32 %v1705_v49, %v1520_v54  ;;  %v1530_v10 = vmul.f32 0.5, %v1526_v52 }
 0xbb8   :  { %v1534_v57 = vmul.f32 %v1532_v55, %v1526_v52  ;;  %v1531_v58 = vmul.f32 0.044715, %v1521_v56  ;;  %v1529_v8 = vmul.f32 0.5, %v1521_v56 }
 0xbba   :  { %v1536_v38 = vmul.f32 %v1534_v57, %v1526_v52  ;;  %v1533_v59 = vmul.f32 %v1531_v58, %v1521_v56 }
 0xbbc   :  { %v1538_v60 = vadd.f32 %v1536_v38, %v1526_v52  ;;  %v1535_v61 = vmul.f32 %v1533_v59, %v1521_v56 }
 0xbbe   :  { %v1540_v63 = vmul.f32 0.7978846, %v1538_v60  ;;  %v1537_v3 = vadd.f32 %v1535_v61, %v1521_v56 }
 0xbc0   :  { %1949 = vtanh.f32 %v1540_v63  ;;  %v1539_v4 = vmul.f32 0.7978846, %v1537_v3 }
 0xbc2   :  { %1951 = vtanh.f32 %v1539_v4 }
 0xbcd   :  { %v1950_v5 = vpop.eup %1949 }
 0xbce   :  { %v1544_v7 = vadd.f32 1.0, %v1950_v5 }
 0xbcf   :  { %v1952_v6 = vpop.eup %1951 }
 0xbd0   :  { %v1543_v9 = vadd.f32 1.0, %v1952_v6  ;;  %v1546_v12 = vmul.f32 %v1544_v7, %v1530_v10 }
 0xbd2   :  { %v1545_v2 = vmul.f32 %v1543_v9, %v1529_v8 }
 0xbd4   :  { %1891 = vmatprep.mubr.msk.f32.mxu1 %vm1562_vm11, %v1545_v2 }
 0xbd5   :  { %1892 = vmatmul.mubr.msk.f32.vlgmr.msra.gmra.mxu1 %vm1562_vm11, %v1546_v12 }
 0xc95   :  { %v1893_v14 = vpop.f32.mrf.mxu1 }
 0xc96   :  { %v1641_v15 = vadd.f32 %v1893_v14, %v1708_v13 }
 0xc97   :  { %v1635_v16 = vpop.f32.mrf.mxu1 }
 0xc98   :  { %v1645_v1 = vadd.f32 %v1641_v15, %v2253_v62  ;;  %v1636_v17 = vadd.f32 %v1708_v13, %v1635_v16 }
 0xc9a   :  { %1647 = vst.msk [vmem:[#allocation5 + $0x8] sm:$0xff] %vm98_vm0, %v1645_v1  ;;  %v1644_v18 = vadd.f32 %v1636_v17, %v2256_v11 }
 0xc9c   :  { %1646 = vst.msk [vmem:[#allocation5] sm:$0xff] %vm98_vm0, %v1644_v18 }
 0xc9d   :  { %1984 = shalt.err (!%p1981_p9)
}
 0xc9e   :  { %1659 = dma.vmem_to_hbm [thread:$0]  %s1654_s14, 256, %s2339_s13, [#allocation4], %s1998_s28, %s1998_s28, %s1999_s29  }
 0xc9f   :  { %1995 = dma.done.wait [#allocation4], 256  }
 0xca0   :  { %1996 = vsyncadd [#allocation4], 4294967040 }
 0xca1   :  { %1663 = vsyncpa [#allocation3], 1 }
 0xca2   :  { %1664 = vsyncpa [#allocation4], 1 }

</bundles_post_ra>
